<compile_context>
chip_gen: v7x
topology: tpu7x:2x2x1
jax: 0.10.0
libtpu: 0.0.40
codegen_flags: <defaults>
</compile_context>

<pallas_src>
import jax
import jax.numpy as jnp
from jax.experimental import pallas as pl
from jax.experimental.pallas import tpu as pltpu

# ---- module hyperparameters (SymbolicLayerL0 defaults) ----
BETA = 2.0 / 3.0
GAMMA = -0.1
ZETA = 1.1
EPSILON = 1e-6
INIT_STDDEV = 0.1

# ---- function set (singles first, then doubles, as the forward's indexing requires) ----
#   singles: identity, square, sin, cos, sigmoid, exp   (6)
#   doubles: product, product                           (2)
N_SINGLE = 6
N_DOUBLE = 2
N_FUNCS = N_SINGLE + N_DOUBLE          # 8
OUT_DIM = N_FUNCS + N_DOUBLE           # 10  (func_in_dim — width of W / qz_log_alpha / u)

# TODO(synk): the optional use_bias=True path (h + bias before the activation units) is not
# wired up; the module default is bias=False.


# --------------------------------------------------------------------------------------
# Stage 1: hard-concrete mask  ->  effective weight  w_eff = clamp(z, 0, 1) * W
# (batch-invariant; computed exactly once instead of per batch tile)
# --------------------------------------------------------------------------------------
def _masked_weight_sample_kernel(w_ref, alpha_ref, u_ref, o_ref):
    u = u_ref[...]
    # log1p(-u) is numerically safer than log(1-u) near u->1; multiply by the constant
    # 1/beta instead of dividing (one fewer EUP reciprocal per element).
    logits = (jnp.log(u) - jnp.log1p(-u) + alpha_ref[...]) * (1.0 / BETA)
    z = jax.nn.sigmoid(logits) * (ZETA - GAMMA) + GAMMA
    o_ref[...] = (jnp.clip(z, 0.0, 1.0) * w_ref[...]).astype(o_ref.dtype)


def _masked_weight_det_kernel(w_ref, alpha_ref, o_ref):
    z = jax.nn.sigmoid(alpha_ref[...]) * (ZETA - GAMMA) + GAMMA
    o_ref[...] = (jnp.clip(z, 0.0, 1.0) * w_ref[...]).astype(o_ref.dtype)


def _masked_weight(W, qz_log_alpha, u, *, sample):
    in_dim = W.shape[0]
    out_shape = jax.ShapeDtypeStruct((in_dim, OUT_DIM), jnp.float32)
    if sample:
        return pl.pallas_call(_masked_weight_sample_kernel, out_shape=out_shape)(
            W, qz_log_alpha, u)
    # deterministic path: `u` is not an input, so it is never DMA'd into VMEM
    return pl.pallas_call(_masked_weight_det_kernel, out_shape=out_shape)(
        W, qz_log_alpha)


# --------------------------------------------------------------------------------------
# Stage 2: batch-tiled  h = x_tile @ w_eff  +  symbolic activation units
# --------------------------------------------------------------------------------------
def _apply_funcs(h):
    """h: [TB, OUT_DIM] -> [TB, N_FUNCS]. Whole-tile transcendentals + iota lane select."""
    lane = jax.lax.broadcasted_iota(jnp.int32, h.shape, dimension=1)
    singles = h                                                   # lane 0: identity
    singles = jnp.where(lane == 1, h * h, singles)                # square
    singles = jnp.where(lane == 2, jnp.sin(h), singles)           # sin
    singles = jnp.where(lane == 3, jnp.cos(h), singles)           # cos
    singles = jnp.where(lane == 4, jax.nn.sigmoid(h), singles)    # sigmoid
    singles = jnp.where(lane == 5, jnp.exp(h), singles)           # exp
    d0 = h[:, 6:7] * h[:, 7:8]                                    # product (double)
    d1 = h[:, 8:9] * h[:, 9:10]                                   # product (double)
    return jnp.concatenate([singles[:, :N_SINGLE], d0, d1], axis=1)


def _matmul_act_kernel(x_ref, w_ref, o_ref):
    h = jnp.dot(x_ref[...], w_ref[...], preferred_element_type=jnp.float32)  # [TB, OUT_DIM]
    o_ref[...] = _apply_funcs(h).astype(o_ref.dtype)


def _choose_block_rows(B, in_dim):
    """Largest power-of-two row tile (>=8) whose double-buffered x+out tiles stay well
    under the most conservative scoped-VMEM default (v5e 16 MiB; also safe on v7x)."""
    budget = 8 * 1024 * 1024
    per_row = (in_dim + N_FUNCS) * 4 * 2          # f32, x + out, double-buffered
    tb = 1024
    while tb > 8 and tb * per_row > budget:
        tb //= 2
    b_pad8 = ((B + 7) // 8) * 8                   # never bigger than the (8-padded) batch
    return max(8, min(tb, b_pad8))


def symbolic_layer_l0_forward(x, W, qz_log_alpha, u=None, *, sample=True, block_rows=None):
    """x:[B,in_dim], W/qz_log_alpha/u:[in_dim,OUT_DIM] -> [B, N_FUNCS] (float32)."""
    B, in_dim = x.shape
    assert W.shape == (in_dim, OUT_DIM)
    if sample and u is None:
        raise ValueError("sample=True requires the concrete-uniform draw `u`.")

    # one-time, batch-invariant effective weight
    w_eff = _masked_weight(W, qz_log_alpha, u, sample=sample)

    if block_rows is None:
        tb = _choose_block_rows(B, in_dim)
    else:
        tb = max(8, ((block_rows + 7) // 8) * 8)

    pad = (-B) % tb
    x_p = jnp.concatenate([x, jnp.zeros((pad, in_dim), x.dtype)], axis=0) if pad else x
    n_blocks = x_p.shape[0] // tb

    out = pl.pallas_call(
        _matmul_act_kernel,
        out_shape=jax.ShapeDtypeStruct((x_p.shape[0], N_FUNCS), jnp.float32),
        grid=(n_blocks,),
        in_specs=[
            pl.BlockSpec((tb, in_dim), lambda i: (i, 0)),       # x: streams, double-buffered
            pl.BlockSpec((in_dim, OUT_DIM), lambda i: (0, 0)),  # w_eff: resident across steps
        ],
        out_specs=pl.BlockSpec((tb, N_FUNCS), lambda i: (i, 0)),
        compiler_params=pltpu.CompilerParams(
            dimension_semantics=("parallel",),                  # megacore-shardable on v7x
        ),
    )(x_p, w_eff)
    return out[:B] if pad else out


# --------------------------------------------------------------------------------------
# Pure-JAX reference (mirrors the PyTorch forward exactly)
# --------------------------------------------------------------------------------------
def reference_forward(x, W, qz_log_alpha, u=None, *, sample=True):
    if sample:
        logits = (jnp.log(u) - jnp.log(1.0 - u) + qz_log_alpha) / BETA
        z = jax.nn.sigmoid(logits) * (ZETA - GAMMA) + GAMMA
    else:
        z = jax.nn.sigmoid(qz_log_alpha) * (ZETA - GAMMA) + GAMMA
    mask = jnp.clip(z, 0.0, 1.0)
    h = x @ (mask * W)
    outs = [
        h[:, 0:1],                      # identity
        h[:, 1:2] * h[:, 1:2],          # square
        jnp.sin(h[:, 2:3]),             # sin
        jnp.cos(h[:, 3:4]),             # cos
        jax.nn.sigmoid(h[:, 4:5]),      # sigmoid
        jnp.exp(h[:, 5:6]),             # exp
        h[:, 6:7] * h[:, 7:8],          # product (double)
        h[:, 8:9] * h[:, 9:10],         # product (double)
    ]
    return jnp.concatenate(outs, axis=1)


if __name__ == "__main__":
    key = jax.random.PRNGKey(0)
    k_x, k_w, k_a, k_u, k_x2 = jax.random.split(key, 5)

    in_dim = 32
    # deterministic parameter init (shapes from the module __init__; no checkpoint load)
    W = INIT_STDDEV * jax.random.normal(k_w, (in_dim, OUT_DIM), dtype=jnp.float32)
    # qz_log_alpha ~ Normal(mean=log(1-p)-log(p)=0 for p=0.5, std=0.01)
    qz_log_alpha = 0.01 * jax.random.normal(k_a, (in_dim, OUT_DIM), dtype=jnp.float32)
    # u for the concrete distribution: Uniform*(1-2*epsilon)+epsilon
    u = (jax.random.uniform(k_u, (in_dim, OUT_DIM), dtype=jnp.float32)
         * (1.0 - 2.0 * EPSILON) + EPSILON)

    # --- small (module-scale) case ---
    batch = 8
    x = jax.random.normal(k_x, (batch, in_dim), dtype=jnp.float32)

    out = jax.block_until_ready(symbolic_layer_l0_forward(x, W, qz_log_alpha, u, sample=True))
    ref = reference_forward(x, W, qz_log_alpha, u, sample=True)
    assert out.shape == (batch, N_FUNCS)
    assert jnp.allclose(out, ref, atol=1e-4, rtol=1e-4), "sample=True mismatch vs. reference"

    out_det = jax.block_until_ready(symbolic_layer_l0_forward(x, W, qz_log_alpha, sample=False))
    ref_det = reference_forward(x, W, qz_log_alpha, sample=False)
    assert jnp.allclose(out_det, ref_det, atol=1e-4, rtol=1e-4), "sample=False mismatch"

    # --- larger batch: exercises multi-step grid, batch padding and the parallel axis ---
    batch2 = 520
    x2 = jax.random.normal(k_x2, (batch2, in_dim), dtype=jnp.float32)
    out2 = jax.block_until_ready(
        symbolic_layer_l0_forward(x2, W, qz_log_alpha, u, sample=True, block_rows=128))
    ref2 = reference_forward(x2, W, qz_log_alpha, u, sample=True)
    assert out2.shape == (batch2, N_FUNCS)
    assert jnp.allclose(out2, ref2, atol=1e-4, rtol=1e-4), "tiled mismatch vs. reference"

    print("KERNEL_OK")
</pallas_src>

<mosaic_0001>
module attributes {stable_mosaic.version = 11 : i64} {
  func.func @_masked_weight_sample_kernel(%arg0: memref<32x10xf32, #tpu.memory_space<vmem>>, %arg1: memref<32x10xf32, #tpu.memory_space<vmem>>, %arg2: memref<32x10xf32, #tpu.memory_space<vmem>>, %arg3: memref<32x10xf32, #tpu.memory_space<vmem>>) attributes {dimension_semantics = [], scalar_prefetch = 0 : i64, scratch_operands = 0 : i64, tpu.core_type = #tpu.core_type<tc>} {
    %c0 = arith.constant 0 : index
    %c0_0 = arith.constant 0 : index
    %0 = vector.load %arg2[%c0, %c0_0] : memref<32x10xf32, #tpu.memory_space<vmem>>, vector<32x10xf32>
    %1 = math.log %0 : vector<32x10xf32>
    %cst = arith.constant 0.000000e+00 : f32
    %2 = vector.broadcast %cst : f32 to vector<32x10xf32>
    %3 = arith.subf %2, %0 : vector<32x10xf32>
    %4 = math.log1p %3 : vector<32x10xf32>
    %5 = arith.subf %1, %4 : vector<32x10xf32>
    %c0_1 = arith.constant 0 : index
    %c0_2 = arith.constant 0 : index
    %6 = vector.load %arg1[%c0_1, %c0_2] : memref<32x10xf32, #tpu.memory_space<vmem>>, vector<32x10xf32>
    %7 = arith.addf %5, %6 : vector<32x10xf32>
    %cst_3 = arith.constant 1.500000e+00 : f32
    %8 = vector.broadcast %cst_3 : f32 to vector<32x10xf32>
    %9 = arith.mulf %7, %8 : vector<32x10xf32>
    %10 = arith.negf %9 : vector<32x10xf32>
    %11 = math.exp %10 : vector<32x10xf32>
    %cst_4 = arith.constant 1.000000e+00 : f32
    %12 = vector.broadcast %cst_4 : f32 to vector<32x10xf32>
    %13 = arith.addf %12, %11 : vector<32x10xf32>
    %14 = arith.divf %12, %13 : vector<32x10xf32>
    %cst_5 = arith.constant 1.200000e+00 : f32
    %15 = vector.broadcast %cst_5 : f32 to vector<32x10xf32>
    %16 = arith.mulf %14, %15 : vector<32x10xf32>
    %cst_6 = arith.constant -1.000000e-01 : f32
    %17 = vector.broadcast %cst_6 : f32 to vector<32x10xf32>
    %18 = arith.addf %16, %17 : vector<32x10xf32>
    %cst_7 = arith.constant 0.000000e+00 : f32
    %cst_8 = arith.constant 1.000000e+00 : f32
    %19 = vector.broadcast %cst_7 : f32 to vector<32x10xf32>
    %20 = arith.maximumf %19, %18 : vector<32x10xf32>
    %21 = vector.broadcast %cst_8 : f32 to vector<32x10xf32>
    %22 = arith.minimumf %21, %20 : vector<32x10xf32>
    %c0_9 = arith.constant 0 : index
    %c0_10 = arith.constant 0 : index
    %23 = vector.load %arg0[%c0_9, %c0_10] : memref<32x10xf32, #tpu.memory_space<vmem>>, vector<32x10xf32>
    %24 = arith.mulf %22, %23 : vector<32x10xf32>
    %c0_11 = arith.constant 0 : index
    %c0_12 = arith.constant 0 : index
    %25 = vector.load %arg3[%c0_11, %c0_12] : memref<32x10xf32, #tpu.memory_space<vmem>>, vector<32x10xf32>
    tpu.vector_store %arg3[%c0_11, %c0_12], %24 {strides = array<i32>} : memref<32x10xf32, #tpu.memory_space<vmem>>, vector<32x10xf32>,
    return
  }
}

</mosaic_0001>

<bundles_post_ra>
// kernel: tpu_custom_call.1
= control target key start
LH: loop header
LB: loop body
LE: loop exit
PB: predicated region body
PF: predicated region fallthrough
CT: control target
= control target key end

     0   :  { %vm130_vm4 = vcmask 80896   ;;  %s259_s2 = inlined_call_operand.vmem [shape: f32[32,10], index: 2, kind: input, shape index: {}]   ;;  %s260_s1 = inlined_call_operand.vmem [shape: f32[32,10], index: 1, kind: input, shape index: {}]   ;;  %s261_s0 = inlined_call_operand.vmem [shape: f32[32,10], index: 0, kind: input, shape index: {}]   ;;  %s262_s3 = inlined_call_operand.vmem [shape: f32[32,10], index: 3, kind: output, shape index: {}]  }
   0x1   :  { %v14_v0 = vld [vmem:[%s259_s2] sm:$0xff]  ;;  %v15_v2 = vld [vmem:[%s259_s2 + $0x8] sm:$0xff]  ;;  %v16_v4 = vld [vmem:[%s259_s2 + $0x10] sm:$0xff] }
   0x2   :  { %v26_v1 = vsub.f32 0.0, %v14_v0  ;;  %143 = vlog2.f32 %v14_v0  ;;  %v27_v3 = vsub.f32 0.0, %v15_v2  ;;  %v17_v6 = vld [vmem:[%s259_s2 + $0x18] sm:$0xff]  ;;  %v28_v8 = vsub.f32 0.0, %v16_v4  ;;  %v70_v41 = vld [vmem:[%s260_s1] sm:$0xff]  ;;  %v71_v45 = vld [vmem:[%s260_s1 + $0x8] sm:$0xff] }
   0x3   :  { %145 = vlog2.f32 %v15_v2  ;;  %v29_v9 = vsub.f32 0.0, %v17_v6  ;;  %v72_v53 = vld [vmem:[%s260_s1 + $0x10] sm:$0xff]  ;;  %v73_v59 = vld [vmem:[%s260_s1 + $0x18] sm:$0xff] }
   0x4   :  { %v30_v5 = vadd.f32 1.0, %v26_v1  ;;  %v39_v7 = vadd.f32 1.0, %v27_v3  ;;  %147 = vlog2.f32 %v16_v4  ;;  %v33_v10 = vmul.f32 -0.5, %v26_v1 }
   0x5   :  { %v48_v11 = vadd.f32 1.0, %v28_v8  ;;  %v42_v12 = vmul.f32 -0.5, %v27_v3  ;;  %v57_v13 = vadd.f32 1.0, %v29_v9  ;;  %v51_v14 = vmul.f32 -0.5, %v28_v8 }
   0x6   :  { %149 = vlog2.f32 %v30_v5  ;;  %v34_v15 = vadd.f32 1.0, %v33_v10  ;;  %v36_v16 = vand.u32 2147483647, %v26_v1  ;;  %v45_v18 = vand.u32 2147483647, %v27_v3 }
   0x7   :  { %151 = vlog2.f32 %v39_v7  ;;  %v43_v17 = vadd.f32 1.0, %v42_v12  ;;  %v60_v19 = vmul.f32 -0.5, %v29_v9  ;;  %v52_v22 = vadd.f32 1.0, %v51_v14 }
   0x8   :  { %153 = vlog2.f32 %v17_v6  ;;  %v35_v24 = vmul.f32 %v34_v15, %v26_v1  ;;  %vm207_vm0 = vcmp.lt.f32.partialorder %v36_v16, 0.0004427343  ;;  %v54_v26 = vand.u32 2147483647, %v28_v8 }
   0x9   :  { %155 = vlog2.f32 %v48_v11  ;;  %v44_v29 = vmul.f32 %v43_v17, %v27_v3  ;;  %vm211_vm1 = vcmp.lt.f32.partialorder %v45_v18, 0.0004427343  ;;  %v61_v31 = vadd.f32 1.0, %v60_v19 }
   0xa   :  { %157 = vlog2.f32 %v57_v13  ;;  %v63_v35 = vand.u32 2147483647, %v29_v9  ;;  %v53_v38 = vmul.f32 %v52_v22, %v28_v8  ;;  %vm55_vm2 = vcmp.lt.f32.partialorder %v54_v26, 0.0004427343 }
   0xb   :  { %v62_v47 = vmul.f32 %v61_v31, %v29_v9 }
   0xc   :  { %v144_v20 = vpop.eup %143  ;;  %vm64_vm3 = vcmp.lt.f32.partialorder %v63_v35, 0.0004427343 }
   0xd   :  { %v146_v21 = vpop.eup %145  ;;  %v19_v28 = vmul.f32 0.6931472, %v144_v20 }
   0xe   :  { %v148_v23 = vpop.eup %147  ;;  %v21_v34 = vmul.f32 0.6931472, %v146_v21 }
   0xf   :  { %v23_v42 = vmul.f32 0.6931472, %v148_v23 }
  0x10   :  { %v150_v27 = vpop.eup %149 }
  0x11   :  { %v152_v32 = vpop.eup %151  ;;  %v32_v33 = vmul.f32 0.6931472, %v150_v27 }
  0x12   :  { %v154_v36 = vpop.eup %153  ;;  %v41_v37 = vmul.f32 0.6931472, %v152_v32 }
  0x13   :  { %v156_v39 = vpop.eup %155  ;;  %v38_v40 = vsel %vm207_vm0, %v35_v24, %v32_v33  ;;  %v25_v50 = vmul.f32 0.6931472, %v154_v36  ;;  %v122_v24 = vld [vmem:[%s261_s0] sm:$0xff] }
  0x14   :  { %v66_v43 = vsub.f32 %v19_v28, %v38_v40  ;;  %v47_v44 = vsel %vm211_vm1, %v44_v29, %v41_v37  ;;  %v50_v46 = vmul.f32 0.6931472, %v156_v39  ;;  %v158_v48 = vpop.eup %157  ;;  %v123_v29 = vld [vmem:[%s261_s0 + $0x8] sm:$0xff] }
  0x15   :  { %v67_v49 = vsub.f32 %v21_v34, %v47_v44  ;;  %v59_v54 = vmul.f32 0.6931472, %v158_v48  ;;  %v124_v34 = vld [vmem:[%s261_s0 + $0x10] sm:$0xff] }
  0x16   :  { %v74_v51 = vadd.f32 %v70_v41, %v66_v43  ;;  %v56_v52 = vsel %vm55_vm2, %v53_v38, %v50_v46  ;;  %v125_v38 = vld [vmem:[%s261_s0 + $0x18] sm:$0xff] }
  0x17   :  { %v75_v55 = vadd.f32 %v71_v45, %v67_v49  ;;  %v68_v56 = vsub.f32 %v23_v42, %v56_v52  ;;  %v65_v58 = vsel %vm64_vm3, %v62_v47, %v59_v54 }
  0x18   :  { %v139_v57 = vmul.f32 -1.5, %v74_v51  ;;  %v69_v62 = vsub.f32 %v25_v50, %v65_v58 }
  0x19   :  { %v140_v60 = vmul.f32 -1.5, %v75_v55  ;;  %v76_v61 = vadd.f32 %v72_v53, %v68_v56 }
  0x1a   :  { %v86_v63 = vmul.f32 1.442695, %v139_v57  ;;  %v77_v2 = vadd.f32 %v73_v59, %v69_v62 }
  0x1b   :  { %v88_v0 = vmul.f32 1.442695, %v140_v60  ;;  %v141_v1 = vmul.f32 -1.5, %v76_v61 }
  0x1c   :  { %159 = vpow2.f32 %v86_v63  ;;  %v142_v4 = vmul.f32 -1.5, %v77_v2 }
  0x1d   :  { %161 = vpow2.f32 %v88_v0  ;;  %v90_v3 = vmul.f32 1.442695, %v141_v1 }
  0x1e   :  { %v92_v5 = vmul.f32 1.442695, %v142_v4 }
  0x1f   :  { %163 = vpow2.f32 %v90_v3 }
  0x20   :  { %165 = vpow2.f32 %v92_v5 }
  0x26   :  { %v160_v6 = vpop.eup %159 }
  0x27   :  { %v162_v7 = vpop.eup %161  ;;  %v94_v8 = vadd.f32 1.0, %v160_v6 }
  0x28   :  { %v95_v9 = vadd.f32 1.0, %v162_v7 }
  0x29   :  { %v164_v10 = vpop.eup %163  ;;  %167 = vrcp.f32 %v94_v8 }
  0x2a   :  { %169 = vrcp.f32 %v95_v9  ;;  %v96_v11 = vadd.f32 1.0, %v164_v10  ;;  %v166_v12 = vpop.eup %165 }
  0x2b   :  { %v97_v13 = vadd.f32 1.0, %v166_v12 }
  0x2c   :  { %171 = vrcp.f32 %v96_v11 }
  0x2d   :  { %173 = vrcp.f32 %v97_v13 }
  0x33   :  { %v168_v14 = vpop.eup %167 }
  0x34   :  { %v170_v15 = vpop.eup %169  ;;  %v106_v16 = vmul.f32 1.2, %v168_v14 }
  0x35   :  { %v107_v17 = vmul.f32 1.2, %v170_v15 }
  0x36   :  { %v172_v18 = vpop.eup %171  ;;  %v110_v19 = vadd.f32 -0.1, %v106_v16 }
  0x37   :  { %v111_v20 = vadd.f32 -0.1, %v107_v17  ;;  %v108_v21 = vmul.f32 1.2, %v172_v18  ;;  %v174_v22 = vpop.eup %173 }
  0x38   :  { %v114_v23 = vmax.f32 %v110_v19, 0.0  ;;  %v109_v27 = vmul.f32 1.2, %v174_v22 }
  0x39   :  { %v115_v25 = vmax.f32 %v111_v20, 0.0  ;;  %v112_v26 = vadd.f32 -0.1, %v108_v21 }
  0x3a   :  { %v118_v28 = vmin.f32 %v114_v23, 1.0  ;;  %v113_v32 = vadd.f32 -0.1, %v109_v27 }
  0x3b   :  { %v119_v30 = vmin.f32 %v115_v25, 1.0  ;;  %v116_v31 = vmax.f32 %v112_v26, 0.0 }
  0x3c   :  { %v126_v33 = vmul.f32 %v122_v24, %v118_v28  ;;  %v117_v37 = vmax.f32 %v113_v32, 0.0 }
  0x3d   :  { %v127_v35 = vmul.f32 %v123_v29, %v119_v30  ;;  %v120_v36 = vmin.f32 %v116_v31, 1.0 }
  0x3e   :  { %131 = vst.msk [vmem:[%s262_s3] sm:$0xff] %vm130_vm4, %v126_v33  ;;  %v121_v40 = vmin.f32 %v117_v37, 1.0 }
  0x3f   :  { %132 = vst.msk [vmem:[%s262_s3 + $0x8] sm:$0xff] %vm130_vm4, %v127_v35  ;;  %v128_v39 = vmul.f32 %v124_v34, %v120_v36 }
  0x40   :  { %v129_v41 = vmul.f32 %v125_v38, %v121_v40 }
  0x41   :  { %133 = vst.msk [vmem:[%s262_s3 + $0x10] sm:$0xff] %vm130_vm4, %v128_v39 }
  0x42   :  { %134 = vst.msk [vmem:[%s262_s3 + $0x18] sm:$0xff] %vm130_vm4, %v129_v41 }

</bundles_post_ra>
